<compile_context>
chip_gen: v5e
topology: v5e:2x2
jax: 0.10.0
libtpu: 0.0.40
codegen_flags: <defaults>
</compile_context>

<pallas_src>
import math

import jax
import jax.numpy as jnp
from jax.experimental import pallas as pl
from jax.experimental.pallas import tpu as pltpu


def _value_kernel(x_ref, w1_ref, b1_ref, w2_ref, b2_ref, w3_ref, b3_ref, out_ref):
    # Cast the streamed x tile to bf16 on-chip (VPU work, hides under the DMA
    # of the next tile) -- no wrapper-side HBM cast pass.
    x = x_ref[...].astype(jnp.bfloat16)                                # [tb, d_in]
    # layer 1: tanh(x @ W1 + b1)   (bf16 MXU, f32 accumulate, f32 tanh)
    h = jnp.tanh(jnp.dot(x, w1_ref[...], preferred_element_type=jnp.float32)
                 + b1_ref[...])                                        # [tb, h1] f32
    # layer 2: tanh(h @ W2 + b2)
    h = jnp.tanh(jnp.dot(h.astype(jnp.bfloat16), w2_ref[...],
                         preferred_element_type=jnp.float32)
                 + b2_ref[...])                                        # [tb, h2] f32
    # output layer (out_features=1): VPU multiply + cross-lane reduce in f32
    v = jnp.sum(h * w3_ref[...], axis=-1, keepdims=True) + b3_ref[...]  # [tb, 1]
    out_ref[...] = v.astype(out_ref.dtype)


def _round_up(n, m):
    return ((n + m - 1) // m) * m


def value_function_forward(x, params, *, max_block_b=4096, min_grid_steps=2):
    """
    x:      [B, D_in] float32
    params: dict with w1 [D_in,H1], b1 [1,H1], w2 [H1,H2], b2 [1,H2],
            w3 [H2,1], b3 [1,1]   (all float32)
    returns [B, 1] float32 value estimates.
    """
    B, d_in = x.shape
    h1 = params["w1"].shape[1]
    h2 = params["w2"].shape[1]

    # Batch tile: as large as possible (amortize per-step overhead) while
    # keeping >= min_grid_steps steps so the parallel axis can be sharded over
    # both v7x TensorCores.  Multiple of 8 (f32 sublane tile) so a partial last
    # block is legal without padding x.
    n_steps_target = max(min_grid_steps, pl.cdiv(B, max_block_b))
    tb = max(8, min(max_block_b, _round_up(pl.cdiv(B, n_steps_target), 8)))
    grid = (pl.cdiv(B, tb),)

    # Weights are tiny: cast to bf16 once in the wrapper; they stay VMEM-resident
    # (constant index_map) across all grid steps.  Biases / w3-row stay f32.
    w1 = params["w1"].astype(jnp.bfloat16)
    w2 = params["w2"].astype(jnp.bfloat16)
    w3_row = params["w3"].reshape(1, h2)            # [1, H2] f32 row for VPU final layer
    b1, b2, b3 = params["b1"], params["b2"], params["b3"]

    out = pl.pallas_call(
        _value_kernel,
        out_shape=jax.ShapeDtypeStruct((B, 1), jnp.float32),
        grid=grid,
        in_specs=[
            pl.BlockSpec((tb, d_in), lambda i: (i, 0)),   # x: streamed over batch (f32)
            pl.BlockSpec((d_in, h1), lambda i: (0, 0)),   # w1 (bf16, VMEM-resident)
            pl.BlockSpec((1, h1),    lambda i: (0, 0)),   # b1
            pl.BlockSpec((h1, h2),   lambda i: (0, 0)),   # w2 (bf16)
            pl.BlockSpec((1, h2),    lambda i: (0, 0)),   # b2
            pl.BlockSpec((1, h2),    lambda i: (0, 0)),   # w3 as row (f32)
            pl.BlockSpec((1, 1),     lambda i: (0, 0)),   # b3
        ],
        out_specs=pl.BlockSpec((tb, 1), lambda i: (i, 0)),
        compiler_params=pltpu.CompilerParams(
            dimension_semantics=("parallel",),            # shard batch across TCs (v7x)
        ),
    )(x, w1, b1, w2, b2, w3_row, b3)

    return out


def value_function_reference(x, params):
    """Pure-JAX f32 reference matching the PyTorch module."""
    a1 = jnp.tanh(x @ params["w1"] + params["b1"])
    a2 = jnp.tanh(a1 @ params["w2"] + params["b2"])
    return a2 @ params["w3"] + params["b3"]


def init_params(key, input_dim, hidden, output_dim=1):
    """Deterministic init mimicking nn.Linear's U(-1/sqrt(fan_in), 1/sqrt(fan_in))."""
    h1, h2 = hidden
    ks = jax.random.split(key, 6)

    def lin(kw, kb, fan_in, fan_out):
        bound = 1.0 / math.sqrt(fan_in)
        w = jax.random.uniform(kw, (fan_in, fan_out), jnp.float32, -bound, bound)
        b = jax.random.uniform(kb, (1, fan_out), jnp.float32, -bound, bound)
        return w, b

    w1, b1 = lin(ks[0], ks[1], input_dim, h1)
    w2, b2 = lin(ks[2], ks[3], h1, h2)
    w3, b3 = lin(ks[4], ks[5], h2, output_dim)
    return {"w1": w1, "b1": b1, "w2": w2, "b2": b2, "w3": w3, "b3": b3}


if __name__ == "__main__":
    # small shapes consistent with the module: state dim 16,
    # hidden_layer_widths=[64, 64]
    D_IN = 16
    HIDDEN = [64, 64]

    root = jax.random.PRNGKey(0)
    k_param, k_x, k_x2 = jax.random.split(root, 3)
    params = init_params(k_param, D_IN, HIDDEN)

    # case 1: tiny batch (single grid step, block == batch rounded to 8)
    B = 8
    x = jax.random.normal(k_x, (B, D_IN), jnp.float32)
    values = jax.block_until_ready(value_function_forward(x, params))
    ref = value_function_reference(x, params)
    assert values.shape == (B, 1)
    assert bool(jnp.all(jnp.isfinite(values)))
    max_err = float(jnp.max(jnp.abs(values - ref)))
    assert max_err < 5e-2, f"max abs error vs f32 reference too large: {max_err}"

    # case 2: exercises the >=2-step parallel grid and the partial last block
    # (no padding of x); out-of-range rows are computed but never written back.
    B2 = 300
    x2 = jax.random.normal(k_x2, (B2, D_IN), jnp.float32)
    values2 = jax.block_until_ready(value_function_forward(x2, params))
    ref2 = value_function_reference(x2, params)
    assert values2.shape == (B2, 1)
    assert bool(jnp.all(jnp.isfinite(values2)))
    max_err2 = float(jnp.max(jnp.abs(values2 - ref2)))
    assert max_err2 < 5e-2, f"max abs error vs f32 reference too large: {max_err2}"

    print("KERNEL_OK")
</pallas_src>

<mosaic_0001>
module attributes {stable_mosaic.version = 11 : i64} {
  func.func @_value_kernel(%arg0: i32, %arg1: memref<8x16xf32, #tpu.memory_space<vmem>>, %arg2: memref<16x64xbf16, #tpu.memory_space<vmem>>, %arg3: memref<1x64xf32, #tpu.memory_space<vmem>>, %arg4: memref<64x64xbf16, #tpu.memory_space<vmem>>, %arg5: memref<1x64xf32, #tpu.memory_space<vmem>>, %arg6: memref<1x64xf32, #tpu.memory_space<vmem>>, %arg7: memref<1x1xf32, #tpu.memory_space<vmem>>, %arg8: memref<8x1xf32, #tpu.memory_space<vmem>>) attributes {dimension_semantics = [#tpu.dimension_semantics<parallel>], iteration_bounds = array<i64: 1>, scalar_prefetch = 0 : i64, scratch_operands = 0 : i64, tpu.core_type = #tpu.core_type<tc>, window_params = [{transform_indices = @transform_0, window_bounds = array<i64: 8, 16>}, {pipeline_mode = #tpu.pipeline_mode<synchronous>, transform_indices = @transform_1, window_bounds = array<i64: 16, 64>}, {pipeline_mode = #tpu.pipeline_mode<synchronous>, transform_indices = @transform_2, window_bounds = array<i64: 1, 64>}, {pipeline_mode = #tpu.pipeline_mode<synchronous>, transform_indices = @transform_3, window_bounds = array<i64: 64, 64>}, {pipeline_mode = #tpu.pipeline_mode<synchronous>, transform_indices = @transform_4, window_bounds = array<i64: 1, 64>}, {pipeline_mode = #tpu.pipeline_mode<synchronous>, transform_indices = @transform_5, window_bounds = array<i64: 1, 64>}, {pipeline_mode = #tpu.pipeline_mode<synchronous>, transform_indices = @transform_6, window_bounds = array<i64: 1, 1>}, {transform_indices = @transform_7, window_bounds = array<i64: 8, 1>}]} {
    %c0 = arith.constant 0 : index
    %c0_0 = arith.constant 0 : index
    %0 = vector.load %arg1[%c0, %c0_0] : memref<8x16xf32, #tpu.memory_space<vmem>>, vector<8x16xf32>
    %1 = arith.truncf %0 : vector<8x16xf32> to vector<8x16xbf16>
    %c0_1 = arith.constant 0 : index
    %c0_2 = arith.constant 0 : index
    %2 = vector.load %arg2[%c0_1, %c0_2] : memref<16x64xbf16, #tpu.memory_space<vmem>>, vector<16x64xbf16>
    %cst = arith.constant dense<0.000000e+00> : vector<8x64xf32>
    %3 = tpu.matmul %1, %2, %cst {dimension_numbers = #tpu.dot_dimension_numbers<[1], [0], [0], [1], [0, 0, 1, 1], [], []>} : vector<8x16xbf16>, vector<16x64xbf16>, vector<8x64xf32> -> vector<8x64xf32>
    %c0_3 = arith.constant 0 : index
    %c0_4 = arith.constant 0 : index
    %4 = vector.load %arg3[%c0_3, %c0_4] : memref<1x64xf32, #tpu.memory_space<vmem>>, vector<1x64xf32>
    %5 = vector.broadcast %4 : vector<1x64xf32> to vector<8x64xf32>
    %6 = arith.addf %3, %5 : vector<8x64xf32>
    %7 = math.tanh %6 : vector<8x64xf32>
    %8 = arith.truncf %7 : vector<8x64xf32> to vector<8x64xbf16>
    %c0_5 = arith.constant 0 : index
    %c0_6 = arith.constant 0 : index
    %9 = vector.load %arg4[%c0_5, %c0_6] : memref<64x64xbf16, #tpu.memory_space<vmem>>, vector<64x64xbf16>
    %cst_7 = arith.constant dense<0.000000e+00> : vector<8x64xf32>
    %10 = tpu.matmul %8, %9, %cst_7 {dimension_numbers = #tpu.dot_dimension_numbers<[1], [0], [0], [1], [0, 0, 1, 1], [], []>} : vector<8x64xbf16>, vector<64x64xbf16>, vector<8x64xf32> -> vector<8x64xf32>
    %c0_8 = arith.constant 0 : index
    %c0_9 = arith.constant 0 : index
    %11 = vector.load %arg5[%c0_8, %c0_9] : memref<1x64xf32, #tpu.memory_space<vmem>>, vector<1x64xf32>
    %12 = vector.broadcast %11 : vector<1x64xf32> to vector<8x64xf32>
    %13 = arith.addf %10, %12 : vector<8x64xf32>
    %14 = math.tanh %13 : vector<8x64xf32>
    %c0_10 = arith.constant 0 : index
    %c0_11 = arith.constant 0 : index
    %15 = vector.load %arg6[%c0_10, %c0_11] : memref<1x64xf32, #tpu.memory_space<vmem>>, vector<1x64xf32>
    %16 = vector.broadcast %15 : vector<1x64xf32> to vector<8x64xf32>
    %17 = arith.mulf %14, %16 : vector<8x64xf32>
    %cst_12 = arith.constant dense<0.000000e+00> : vector<8xf32>
    %18 = vector.multi_reduction <add>, %17, %cst_12 [1] : vector<8x64xf32> to vector<8xf32>
    %19 = vector.shape_cast %18 : vector<8xf32> to vector<8x1xf32>
    %c0_13 = arith.constant 0 : index
    %c0_14 = arith.constant 0 : index
    %20 = vector.load %arg7[%c0_13, %c0_14] : memref<1x1xf32, #tpu.memory_space<vmem>>, vector<1x1xf32>
    %21 = vector.broadcast %20 : vector<1x1xf32> to vector<8x1xf32>
    %22 = arith.addf %19, %21 : vector<8x1xf32>
    %c0_15 = arith.constant 0 : index
    %c0_16 = arith.constant 0 : index
    %23 = vector.load %arg8[%c0_15, %c0_16] : memref<8x1xf32, #tpu.memory_space<vmem>>, vector<8x1xf32>
    tpu.vector_store %arg8[%c0_15, %c0_16], %22 {strides = array<i32>} : memref<8x1xf32, #tpu.memory_space<vmem>>, vector<8x1xf32>,
    return
  }
  func.func @transform_0(%arg0: i32) -> (i32, i32) {
    %c0_i32 = arith.constant 0 : i32
    %c0_i32_0 = arith.constant 0 : i32
    return %arg0, %c0_i32 : i32, i32
  }
  func.func @transform_1(%arg0: i32) -> (i32, i32) {
    %c0_i32 = arith.constant 0 : i32
    %c0_i32_0 = arith.constant 0 : i32
    %c0_i32_1 = arith.constant 0 : i32
    return %c0_i32, %c0_i32_0 : i32, i32
  }
  func.func @transform_2(%arg0: i32) -> (i32, i32) {
    %c0_i32 = arith.constant 0 : i32
    %c0_i32_0 = arith.constant 0 : i32
    %c0_i32_1 = arith.constant 0 : i32
    return %c0_i32, %c0_i32_0 : i32, i32
  }
  func.func @transform_3(%arg0: i32) -> (i32, i32) {
    %c0_i32 = arith.constant 0 : i32
    %c0_i32_0 = arith.constant 0 : i32
    %c0_i32_1 = arith.constant 0 : i32
    return %c0_i32, %c0_i32_0 : i32, i32
  }
  func.func @transform_4(%arg0: i32) -> (i32, i32) {
    %c0_i32 = arith.constant 0 : i32
    %c0_i32_0 = arith.constant 0 : i32
    %c0_i32_1 = arith.constant 0 : i32
    return %c0_i32, %c0_i32_0 : i32, i32
  }
  func.func @transform_5(%arg0: i32) -> (i32, i32) {
    %c0_i32 = arith.constant 0 : i32
    %c0_i32_0 = arith.constant 0 : i32
    %c0_i32_1 = arith.constant 0 : i32
    return %c0_i32, %c0_i32_0 : i32, i32
  }
  func.func @transform_6(%arg0: i32) -> (i32, i32) {
    %c0_i32 = arith.constant 0 : i32
    %c0_i32_0 = arith.constant 0 : i32
    %c0_i32_1 = arith.constant 0 : i32
    return %c0_i32, %c0_i32_0 : i32, i32
  }
  func.func @transform_7(%arg0: i32) -> (i32, i32) {
    %c0_i32 = arith.constant 0 : i32
    %c0_i32_0 = arith.constant 0 : i32
    return %arg0, %c0_i32 : i32, i32
  }
}

</mosaic_0001>

<bundles_post_ra>
// kernel: tpu_custom_call.1
= control target key start
LH: loop header
LB: loop body
LE: loop exit
PB: predicated region body
PF: predicated region fallthrough
CT: control target
= control target key end

     0   :  { %s367_s0 = inlined_call_operand.hbm [shape: f32[8,16], index: 0, kind: input, shape index: {}]   ;;  %s368_s1 = inlined_call_operand.hbm [shape: bf16[16,64], index: 1, kind: input, shape index: {}]   ;;  %s369_s2 = inlined_call_operand.vmem [shape: f32[1,64], index: 2, kind: input, shape index: {}]   ;;  %s370_s3 = inlined_call_operand.hbm [shape: bf16[64,64], index: 3, kind: input, shape index: {}]   ;;  %s371_s4 = inlined_call_operand.vmem [shape: f32[1,64], index: 4, kind: input, shape index: {}]   ;;  %s372_s5 = inlined_call_operand.vmem [shape: f32[1,64], index: 5, kind: input, shape index: {}]   ;;  %s373_s6 = inlined_call_operand.<no memory space> [shape: f32[1,1], index: 6, kind: input, shape index: {}]   ;;  %s374_s7 = inlined_call_operand.vmem [shape: f32[8,1], index: 7, kind: output, shape index: {}]  }
   0x1   :  { %v12_v0 = vstv %s373_s6 }
   0x2   :  { %13 = vst [vmem:[#allocation2] sm:$0x1] %v12_v0 }
   0x3   :  { %14 = vsyncpa [#allocation4], 0 }
   0x4   :  { %15 = vsyncpa [#allocation6], 0  ;;  %s31_s28 = sshll.u32 %s368_s1, 4  ;;  %s298_s29 = smov [#allocation5]   ;;  %s32_s28 = int_to_ptr.hbm [resolvable:$true] %s31_s28 }
   0x5   :  { %s33_s30 = sshll.u32 %s298_s29, 4  ;;  %s21_s10 = sshll.u32 %s367_s0, 4  ;;  %s34_s30 = int_to_ptr.vmem [resolvable:$true] %s33_s30  ;;  %s22_s10 = int_to_ptr.hbm [resolvable:$true] %s21_s10 }
   0x6   :  { %s299_s11 = smov 64   ;;  %s300_s12 = smov 4  }
   0x7   :  { %39 = dma.hbm_to_vmem [thread:$0]  %s32_s28, 128, %s34_s30, [#allocation6], %s299_s11, %s299_s11, %s300_s12  }
   0x8   :  { %s301_s6 = smov [#allocation3]   ;;  %s46_s16 = sshll.u32 %s370_s3, 4  ;;  %s47_s16 = int_to_ptr.hbm [resolvable:$true] %s46_s16 }
   0x9   :  { %s23_s13 = sshll.u32 %s301_s6, 4  ;;  %s302_s1 = smov [#allocation7]   ;;  %s24_s13 = int_to_ptr.vmem [resolvable:$true] %s23_s13 }
   0xa   :  { %26 = dma.hbm_to_vmem [thread:$0]  %s22_s10, 128, %s24_s13, [#allocation4]  }
   0xb   :  { %s48_s17 = sshll.u32 %s302_s1, 4  ;;  %s49_s17 = int_to_ptr.vmem [resolvable:$true] %s48_s17 }
   0xc   :  { %54 = dma.hbm_to_vmem [thread:$0]  %s47_s16, 512, %s49_s17, [#allocation6], %s299_s11, %s299_s11, %s300_s12  }
   0xd   :  { %294 = dma.done.wait [#allocation4], 128  }
   0xe   :  { %295 = vsyncadd [#allocation4], 4294967168 }
   0xf   :  { %296 = dma.done.wait [#allocation6], 640  }
  0x10   :  { %297 = vsyncadd [#allocation6], 4294966656  ;;  %v204_v1 = vld [vmem:[#allocation5] sm:$0xff]  ;;  %v74_v2 = vld [vmem:[#allocation3] sm:$0xff]  ;;  %vm88_vm0 = vcmask 130048   ;;  %vm143_vm1 = vcmask 523264  }
  0x11   :  { %v208_v3 = vld [vmem:[#allocation7 + $0x18] sm:$0xff]  ;;  %v75_v4 = vpack.c.bf16 %v74_v2, %v74_v2  ;;  %99 = vmatpush.bf16.msra.mxu0 %v204_v1  ;;  %v207_v5 = vld [vmem:[#allocation7 + $0x10] sm:$0xff]  ;;  %v206_v6 = vld [vmem:[#allocation7 + $0x8] sm:$0xff]  ;;  %vm174_vm2 = vcmask 7168  }
  0x12   :  { %151 = vmatpush.bf16.msra.mxu1 %v208_v3  ;;  %v205_v7 = vld [vmem:[#allocation7] sm:$0xff]  ;;  %v214_v8 = vld [vmem:[%s369_s2] ss:$0 sm:$0xff] }
  0x13   :  { %v215_v14 = vld [vmem:[%s371_s4] ss:$0 sm:$0xff] }
  0x14   :  { %186 = vmatmul.msk.bf16.vlgmr.msra.gmra.mxu0 %vm88_vm0, %v75_v4  ;;  %v216_v17 = vld [vmem:[%s372_s5] ss:$0 sm:$0xff] }
  0x15   :  { %v217_v22 = vld [vmem:[#allocation2] ss:$0 sm:$0xff] }
  0x16   :  { %152 = vmatpush.bf16.msra.mxu1 %v207_v5 }
  0x1a   :  { %153 = vmatpush.bf16.msra.mxu1 %v206_v6 }
  0x1e   :  { %154 = vmatpush.bf16.msra.mxu1 %v205_v7 }
  0x91   :  { %v101_v9 = vpop.f32.mrf.mxu0 }
  0x92   :  { %v102_v10 = vadd.f32 %v214_v8, %v101_v9 }
  0x94   :  { %218 = vtanh.f32 %v102_v10 }
  0x99   :  { %v103_v11 = vpop.f32.mrf.mxu0 }
  0x9a   :  { %v219_v12 = vpop.eup %218 }
  0x9b   :  { %v106_v13 = vpack.c.bf16 %v219_v12, %v219_v12 }
  0x9d   :  { %203 = vmatmul.msk.bf16.vlgmr.msra.gmra.mxu1 %vm143_vm1, %v106_v13 }
 0x11a   :  { %v156_v15 = vpop.f32.mrf.mxu1 }
 0x11b   :  { %v157_v16 = vadd.f32 %v215_v14, %v156_v15 }
 0x11d   :  { %220 = vtanh.f32 %v157_v16 }
 0x122   :  { %v158_v18 = vpop.f32.mrf.mxu1 }
 0x123   :  { %v221_v19 = vpop.eup %220 }
 0x124   :  { %v165_v20 = vmul.f32 %v221_v19, %v216_v17 }
 0x126   :  { %v166_v21 = vsel %vm143_vm1, %v165_v20, 0.0 }
 0x127   :  { %167 = vadd.xlane.f32.xlu0 %v166_v21 }
 0x19a   :  { %v168_v23 = vpop.xlane.xlu0 %167 }
 0x19b   :  { %v173_v24 = vadd.f32 %v217_v22, %v168_v23 }
 0x19d   :  { %175 = vst.msk [vmem:[%s374_s7] sm:$0xff] %vm174_vm2, %v173_v24 }
 0x19e   :  { %180 = vsyncpa [#allocation4], 1 }
 0x19f   :  { %181 = vsyncpa [#allocation6], 1 }

</bundles_post_ra>
